<compile_context>
chip_gen: v6e
topology: v6e:2x2x1
jax: 0.10.0
libtpu: 0.0.40
codegen_flags: <defaults>
</compile_context>

<pallas_src>
import functools

import jax
import jax.numpy as jnp
from jax.experimental import pallas as pl
from jax.experimental.pallas import tpu as pltpu


def _round_up(x: int, m: int) -> int:
    return ((x + m - 1) // m) * m


def _rescale_kernel(c_ref, d_ref, o_ref):
    # c_ref: (tm, tn) tile of C, d_ref: (1, tn) tile of D, o_ref: (tm, tn).
    # Pure VPU broadcast multiply; HBM DMA dominates, keep the body minimal.
    o_ref[...] = (c_ref[...] * d_ref[...]).astype(o_ref.dtype)


@functools.partial(jax.jit, static_argnames=("target_tile_bytes",))
def rescale(C: jax.Array, D: jax.Array, *, target_tile_bytes: int = 8 << 20) -> jax.Array:
    """Compute C @ diag(D) (column scale) with a Pallas TPU kernel.

    C: [M, Nr], D: [Nr]. Returns [M, Nr] with the same dtype as C.
    Arbitrary M / Nr are handled without padding: partial tail blocks are
    masked by Pallas.
    """
    M, Nr = C.shape
    assert D.shape == (Nr,)
    out_dtype = C.dtype
    in_itemsize = jnp.dtype(C.dtype).itemsize
    out_itemsize = jnp.dtype(out_dtype).itemsize

    # D as a broadcast row in C's dtype (exact for f32; one rounding for
    # bf16 — equivalent to a native low-precision torch multiply).
    d_row = D.astype(C.dtype).reshape(1, Nr)

    vmem_budget = 40 << 20  # target for the double-buffered per-step footprint

    # --- column tiling decision --------------------------------------------
    # Common path: full Nr width per block (block dim == full array dim, so
    # no 128-divisibility requirement and no padding needed).
    # Rare path (very wide Nr): tile columns in multiples of 128 so even the
    # minimum 8-row tile fits the VMEM budget.
    min_row_footprint = (2 * 8 * Nr * (in_itemsize + out_itemsize)
                         + 2 * Nr * in_itemsize)
    if min_row_footprint <= vmem_budget:
        tile_cols = Nr
        col_grid = 1
    else:
        tile_cols = 4096  # multiple of 128; tail column block is masked
        col_grid = pl.cdiv(Nr, tile_cols)

    # --- row tile: biggest tile near target_tile_bytes ----------------------
    bytes_per_row = tile_cols * max(in_itemsize, out_itemsize)
    tm = (target_tile_bytes // bytes_per_row) // 8 * 8
    tm = int(max(8, min(tm, 16384)))
    # Megacore (v7x has 2 TensorCores): make sure the parallel row axis has
    # >= 2 steps whenever M is large enough to split, so both cores get work.
    if M > 8:
        tm = min(tm, max(8, _round_up(pl.cdiv(M, 2), 8)))
    tm = min(tm, _round_up(M, 8))
    row_grid = pl.cdiv(M, tm)

    # --- scoped-VMEM budget: double-buffered C tile + out tile + D tile -----
    c_tile_bytes = tm * tile_cols * in_itemsize
    o_tile_bytes = tm * tile_cols * out_itemsize
    d_tile_bytes = tile_cols * in_itemsize
    needed = 2 * (c_tile_bytes + o_tile_bytes + d_tile_bytes) + (4 << 20)
    vmem_limit = int(min(max(needed, 32 << 20), 48 << 20))

    out = pl.pallas_call(
        _rescale_kernel,
        out_shape=jax.ShapeDtypeStruct((M, Nr), out_dtype),
        grid_spec=pl.GridSpec(
            grid=(row_grid, col_grid),
            in_specs=[
                pl.BlockSpec((tm, tile_cols), lambda i, j: (i, j)),  # C tile
                pl.BlockSpec((1, tile_cols), lambda i, j: (0, j)),   # D row
            ],
            out_specs=pl.BlockSpec((tm, tile_cols), lambda i, j: (i, j)),
        ),
        compiler_params=pltpu.CompilerParams(
            dimension_semantics=("parallel", "parallel"),
            vmem_limit_bytes=vmem_limit,
        ),
    )(C, d_row)

    return out
    # TODO(synk): for best end-to-end perf this column scale should be fused
    # into the producing/consuming kernel (standalone it pays a full M*Nr HBM
    # read+write round trip that no in-kernel tuning can remove).


if __name__ == "__main__":
    key = jax.random.PRNGKey(0)
    k1, k2, k3 = jax.random.split(key, 3)

    # Shapes consistent with the module: C is [M, Nr], D is the learnable
    # diagonal of length Nr (init = ones in __init__; random here so the
    # check is non-trivial). Non-aligned shape exercises the masked-tail
    # (no-pad) path.
    M, Nr = 50, 96
    C = jax.random.normal(k1, (M, Nr), dtype=jnp.float32)
    D = jax.random.normal(k2, (Nr,), dtype=jnp.float32)

    out = jax.block_until_ready(rescale(C, D))
    ref = C * D[None, :]  # == C @ diag(D)
    assert out.shape == (M, Nr)
    assert out.dtype == C.dtype
    assert jnp.allclose(out, ref, atol=1e-6, rtol=1e-6), "mismatch vs C @ diag(D)"

    # Aligned shape with D == ones (the module's init), output must equal C.
    M2, Nr2 = 64, 128
    C2 = jax.random.normal(k3, (M2, Nr2), dtype=jnp.float32)
    D2 = jnp.ones((Nr2,), dtype=jnp.float32)
    out2 = jax.block_until_ready(rescale(C2, D2))
    assert jnp.allclose(out2, C2, atol=1e-6), "mismatch for D == ones"

    print("KERNEL_OK")
</pallas_src>

<mosaic_0001>
module attributes {stable_mosaic.version = 11 : i64} {
  func.func @_rescale_kernel(%arg0: i32, %arg1: i32, %arg2: memref<32x96xf32, #tpu.memory_space<vmem>>, %arg3: memref<1x96xf32, #tpu.memory_space<vmem>>, %arg4: memref<32x96xf32, #tpu.memory_space<vmem>>) attributes {dimension_semantics = [#tpu.dimension_semantics<parallel>, #tpu.dimension_semantics<parallel>], iteration_bounds = array<i64: 2, 1>, scalar_prefetch = 0 : i64, scratch_operands = 0 : i64, tpu.core_type = #tpu.core_type<tc>, window_params = [{transform_indices = @transform_0, window_bounds = array<i64: 32, 96>}, {transform_indices = @transform_1, window_bounds = array<i64: 1, 96>}, {transform_indices = @transform_2, window_bounds = array<i64: 32, 96>}]} {
    %c0 = arith.constant 0 : index
    %c0_0 = arith.constant 0 : index
    %0 = vector.load %arg2[%c0, %c0_0] : memref<32x96xf32, #tpu.memory_space<vmem>>, vector<32x96xf32>
    %c0_1 = arith.constant 0 : index
    %c0_2 = arith.constant 0 : index
    %1 = vector.load %arg3[%c0_1, %c0_2] : memref<1x96xf32, #tpu.memory_space<vmem>>, vector<1x96xf32>
    %2 = vector.broadcast %1 : vector<1x96xf32> to vector<32x96xf32>
    %3 = arith.mulf %0, %2 : vector<32x96xf32>
    %c0_3 = arith.constant 0 : index
    %c0_4 = arith.constant 0 : index
    %4 = vector.load %arg4[%c0_3, %c0_4] : memref<32x96xf32, #tpu.memory_space<vmem>>, vector<32x96xf32>
    tpu.vector_store %arg4[%c0_3, %c0_4], %3 {strides = array<i32>} : memref<32x96xf32, #tpu.memory_space<vmem>>, vector<32x96xf32>,
    return
  }
  func.func @transform_0(%arg0: i32, %arg1: i32) -> (i32, i32) {
    %c0_i32 = arith.constant 0 : i32
    return %arg0, %arg1 : i32, i32
  }
  func.func @transform_1(%arg0: i32, %arg1: i32) -> (i32, i32) {
    %c0_i32 = arith.constant 0 : i32
    %c0_i32_0 = arith.constant 0 : i32
    return %c0_i32, %arg1 : i32, i32
  }
  func.func @transform_2(%arg0: i32, %arg1: i32) -> (i32, i32) {
    %c0_i32 = arith.constant 0 : i32
    return %arg0, %arg1 : i32, i32
  }
}

</mosaic_0001>

<bundles_post_ra>
// kernel: rescale.1
= control target key start
LH: loop header
LB: loop body
LE: loop exit
PB: predicated region body
PF: predicated region fallthrough
CT: control target
= control target key end

     0   :  { %7 = vsyncpa [#allocation3], 0  ;;  %s740_s0 = inlined_call_operand.hbm [shape: f32[50,96], index: 0, kind: input, shape index: {}]   ;;  %s741_s1 = inlined_call_operand.vmem [shape: f32[1,96], index: 1, kind: input, shape index: {}]   ;;  %s742_s2 = inlined_call_operand.hbm [shape: f32[50,96], index: 2, kind: output, shape index: {}]  }
   0x1   :  { %9 = vsyncpa [#allocation3 + $0x1], 0 }
   0x2   :  { %10 = vsyncpa [#allocation4], 0 }
   0x3   :  { %12 = vsyncpa [#allocation4 + $0x1], 0  ;;  %s562_s9 = smov 0   ;;  %s564_s10 = smov 0  }
   0x4   :  { %s566_s11 = smov 0   ;;  %s568_s12 = smov 0  }
   0x5   :  { %s570_s13 = smov 0   ;;  %s572_s14 = smov 0  }
   0x6 LB: > { %s347_s15 = sadd.s32 4294967295, %s539_s14   ;;  %s348_s16 = sadd.s32 4294967294, %s539_s14   ;;  %s539_s14 = sphi %s572_s14, %s18_s14   ;;  %s535_s13 = sphi %s570_s13, %s752_s13   ;;  %s531_s12 = sphi %s568_s12, %s751_s12   ;;  %s527_s11 = sphi %s566_s11, %s750_s11   ;;  %s523_s10 = sphi %s564_s10, %s749_s10   ;;  %s519_s9 = sphi %s562_s9, %s748_s9  }
   0x7   : > { %s30_s17 = sadd.s32 1, %s535_s13  ;;  %s39_s18 = sadd.s32 1, %s527_s11 }
   0x8   : > { %p32_p0 = scmp.ge.s32.totalorder %s30_s17, 2  ;;  %p46_p1 = scmp.ne.s32.totalorder %s527_s11, %s523_s10 }
   0x9   : > { %p47_p2 = scmp.eq.s32.totalorder %s539_s14, 0  ;;  %p52_p3 = scmp.ne.s32.totalorder %s523_s10, %s519_s9 }
   0xa   : > { %s754_s17 = smov (%p32_p0, %s30_s17), 0  ;;  %p53_p5 = scmp.eq.s32.totalorder %s347_s15, 0 }
   0xb   : > { %p48_p4 = por %p47_p2, %p46_p1  ;;  %s34_s19 = ssub.s32 %s535_s13, %s754_s17 }
   0xc   : > { %p104_p6 = scmp.eq.s32.totalorder %s347_s15, 1  ;;  %p37_p7 = scmp.eq.s32.totalorder %s34_s19, 0 }
   0xd   : > { %p605_p8 = por %p53_p5, %p52_p3  ;;  %p110_p10 = scmp.eq.s32.totalorder %s348_s16, 1 }
   0xe   : > { %p609_p9 = por %p104_p6, %p46_p1  ;;  %p743_p12 = scmp.ge.s32.totalorder %s539_s14, 2 }
   0xf   : > { %s614_s22 = scalar_select %p37_p7, %s527_s11, %s39_s18  }
  0x10   : > { %p616_p11 = por %p110_p10, %p52_p3  ;;  %132 = sbr.rel (%p743_p12) target bundleno = 53 (0x35), region = 20 }
  0x15   : > { %135 = sbr.rel (!%p48_p4) target bundleno = 53 (0x35), region = 24  ;;  %s136_s24 = sand.u32 (%p48_p4), 1, %s527_s11  }
  0x16   : > { %s353_s25 = sshll.u32 (%p48_p4), %s535_s13, 2  ;;  %s352_s26 = sshll.u32 (%p48_p4), %s136_s24, 5 }
  0x17   : > { %s142_s27 = ssub.s32 (%p48_p4), 7, %s353_s25  ;;  %s628_s30 = scalar_lea.sflag (%p48_p4), [#allocation3], %s136_s24 }
  0x18   : > { %p143_p13 = scmp.lt.s32.totalorder (%p48_p4), %s142_s27, 4  ;;  %s140_s3 = scalar_lea.vmem (%p48_p4), [#allocation2], %s352_s26 }
  0x1a   : > { %s756_s27 = smov (!%p143_p13, %s142_s27), 4 }
  0x1b   : > { %s625_s28 = sshll.u32 %s756_s27, 7 }
  0x1c   : > { %s147_s29 = ssub.s32 512, %s625_s28 }
  0x1d   : > { %148 = vsyncadd %s628_s30, %s147_s29  ;;  %p355_p0 = scmp.ne.s32.totalorder %s625_s28, 0  ;;  %s372_s4 = sshll.u32 %s535_s13, 9 }
  0x1e   : > { %s636_s7 = scalar_lea.hbm %s740_s0, %s372_s4  ;;  %s154_s8 = sshll.u32 %s140_s3, 4  ;;  %s638_s8 = int_to_ptr.vmem [resolvable:$true] %s154_s8 }
  0x1f   : > { %s433_s15 = scalar_lea.hbm %s636_s7, %s625_s28  ;;  %s437_s19 = scalar_lea.hbm %s740_s0, 896 }
  0x20   : > { %p434_p1 = scmp.ne.s32.totalorder %s636_s7, %s433_s15  ;;  %p439_p4 = scmp.lt.s32.totalorder %s437_s19, %s433_s15 }
  0x22   : > { %p435_p2 = pnand %p434_p1, %p355_p0 }
  0x24   : > { %p436_p3 = pneg %p435_p2 }
  0x26   : > { %p441_p5 = pnand %p439_p4, %p436_p3 }
  0x28   : > { %444 = shalt.err (!%p441_p5)
}
  0x29   : > { %s445_s24 = scalar_lea.vmem %s638_s8, %s625_s28  ;;  %s541_s25 = smov [#allocation2]  }
  0x2a   : > { %p446_p6 = scmp.ne.s32.totalorder %s638_s8, %s445_s24  ;;  %s449_s26 = sshll.u32 %s541_s25, 4  ;;  %s450_s26 = int_to_ptr.vmem [resolvable:$false] %s449_s26 }
  0x2b   : > { %s451_s27 = scalar_lea.vmem %s450_s26, 1024  ;;  %p452_p13 = scmp.lt.s32.totalorder %s638_s8, %s450_s26 }
  0x2c   : > { %p447_p7 = pnand %p446_p6, %p355_p0  ;;  %p453_p1 = scmp.lt.s32.totalorder %s451_s27, %s445_s24 }
  0x2e   : > { %p448_p10 = pneg %p447_p7  ;;  %p454_p2 = por %p453_p1, %p452_p13 }
  0x30   : > { %p455_p12 = pnand %p454_p2, %p448_p10 }
  0x32   : > { %458 = shalt.err (!%p455_p12)
}
  0x33   : > { %s542_s29 = smov 128   ;;  %s543_s3 = smov 8  }
  0x34   : > { %160 = dma.hbm_to_vmem [thread:$0]  (%p355_p0), %s636_s7, %s625_s28, %s638_s8, %s628_s30, %s542_s29, %s542_s29, %s543_s3  }
  0x35 PF: > { %p359_p3 = scmp.ge.s32.totalorder %s539_s14, 1  ;;  %p162_p4 = scmp.lt.s32.totalorder %s539_s14, 3 }
  0x37   : > { %p163_p5 = pnand %p359_p3, %p162_p4 }
  0x38   : > { %s663_s4 = sand.u32 (!%p163_p5), 1, %s523_s10  }
  0x39   : > { %166 = sbr.rel (%p163_p5) target bundleno = 96 (0x60), region = 28  ;;  %s360_s5 = sshll.u32 (!%p163_p5), %s663_s4, 5 }
  0x3a   : > { %s169_s6 = scalar_lea.sflag (!%p163_p5), [#allocation3], %s663_s4  ;;  %s172_s15 = scalar_lea.vmem (!%p163_p5), [#allocation2], %s360_s5 }
  0x3e   : > { %510 = dma.done.wait (%p605_p8), %s169_s6, 512  }
  0x3f   : > { %512 = vsyncadd (%p605_p8), %s169_s6, 4294966784  ;;  %v209_v0 = vld [vmem:[%s172_s15] sm:$0xff]  ;;  %vm224_vm0 = vcmask 785408   ;;  %v210_v2 = vld [vmem:[%s172_s15 + $0x8] sm:$0xff]  ;;  %s195_s7 = scalar_lea.vmem [#allocation5], %s360_s5  ;;  %s230_s20 = scalar_lea.sflag [#allocation4], %s663_s4 }
  0x40   : > { %v362_v1 = vld [vmem:[%s741_s1] ss:$0 sm:$0xff]  ;;  %v211_v5 = vld [vmem:[%s172_s15 + $0x10] sm:$0xff]  ;;  %v212_v6 = vld [vmem:[%s172_s15 + $0x18] sm:$0xff]  ;;  %236 = sbr.rel (!%p609_p9) target bundleno = 96 (0x60), region = 36  ;;  %s364_s8 = sshll.u32 (%p609_p9), %s531_s12, 2 }
  0x41   : > { %v220_v3 = vmul.f32 %v362_v1, %v209_v0  ;;  %v221_v4 = vmul.f32 %v362_v1, %v210_v2  ;;  %v222_v7 = vmul.f32 %v362_v1, %v211_v5  ;;  %v223_v8 = vmul.f32 %v362_v1, %v212_v6  ;;  %s238_s16 = ssub.s32 (%p609_p9), 7, %s364_s8 }
  0x42   : > { %p239_p8 = scmp.lt.s32.totalorder (%p609_p9), %s238_s16, 4 }
  0x43   : > { %225 = vst.msk [vmem:[%s195_s7] sm:$0xff] %vm224_vm0, %v220_v3  ;;  %226 = vst.msk [vmem:[%s195_s7 + $0x8] sm:$0xff] %vm224_vm0, %v221_v4 }
  0x44   : > { %227 = vst.msk [vmem:[%s195_s7 + $0x10] sm:$0xff] %vm224_vm0, %v222_v7  ;;  %228 = vst.msk [vmem:[%s195_s7 + $0x18] sm:$0xff] %vm224_vm0, %v223_v8 }
  0x45   : > { %s758_s16 = smov (!%p239_p8, %s238_s16), 4 }
  0x46   : > { %s678_s18 = sshll.u32 %s758_s16, 7 }
  0x47   : > { %s243_s19 = ssub.s32 512, %s678_s18 }
  0x48   : > { %244 = vsyncadd %s230_s20, %s243_s19  ;;  %p366_p12 = scmp.ne.s32.totalorder %s678_s18, 0  ;;  %s373_s24 = sshll.u32 %s531_s12, 9 }
  0x49   : > { %s688_s26 = scalar_lea.hbm %s742_s2, %s373_s24  ;;  %s250_s27 = sshll.u32 %s195_s7, 4  ;;  %s690_s27 = int_to_ptr.vmem [resolvable:$true] %s250_s27 }
  0x4a   : > { %s459_s29 = scalar_lea.vmem %s690_s27, %s678_s18  ;;  %s544_s3 = smov [#allocation5]  }
  0x4b   : > { %p460_p9 = scmp.ne.s32.totalorder %s690_s27, %s459_s29  ;;  %s463_s5 = sshll.u32 %s544_s3, 4  ;;  %s464_s5 = int_to_ptr.vmem [resolvable:$false] %s463_s5 }
  0x4c   : > { %s465_s12 = scalar_lea.vmem %s464_s5, 1024  ;;  %p466_p7 = scmp.lt.s32.totalorder %s690_s27, %s464_s5 }
  0x4d   : > { %p461_p0 = pnand %p460_p9, %p366_p12  ;;  %p467_p10 = scmp.lt.s32.totalorder %s465_s12, %s459_s29 }
  0x4f   : > { %p462_p6 = pneg %p461_p0  ;;  %p468_p13 = por %p467_p10, %p466_p7 }
  0x51   : > { %p469_p1 = pnand %p468_p13, %p462_p6 }
  0x53   : > { %472 = shalt.err (!%p469_p1)
}
  0x54   : > { %s473_s6 = scalar_lea.hbm %s688_s26, %s678_s18  ;;  %s477_s30 = scalar_lea.hbm %s742_s2, 896 }
  0x55   : > { %p474_p2 = scmp.ne.s32.totalorder %s688_s26, %s473_s6  ;;  %p478_p5 = scmp.lt.s32.totalorder %s688_s26, %s742_s2 }
  0x56   : > { %p479_p8 = scmp.lt.s32.totalorder %s477_s30, %s473_s6 }
  0x57   : > { %p475_p3 = pnand %p474_p2, %p366_p12 }
  0x58   : > { %p480_p9 = por %p479_p8, %p478_p5 }
  0x59   : > { %p476_p4 = pneg %p475_p3 }
  0x5b   : > { %p481_p0 = pnand %p480_p9, %p476_p4 }
  0x5d   : > { %484 = shalt.err (!%p481_p0)
}
  0x5e   : > { %s545_s16 = smov 128   ;;  %s546_s19 = smov 8  }
  0x5f   : > { %256 = dma.vmem_to_hbm [thread:$0]  (%p366_p12), %s690_s27, %s678_s18, %s688_s26, %s230_s20, %s545_s16, %s545_s16, %s546_s19  }
  0x60 PF: > { %s265_s24 = sand.u32 1, %s519_s9   ;;  %p747_p6 = scmp.ge.s32.totalorder %s539_s14, 2 }
  0x61   : > { %s266_s21 = scalar_lea.sflag [#allocation4], %s265_s24 }
  0x62   : > { %p377_p7 = pnand %p747_p6, %p616_p11 }
  0x64   : > { %p378_p10 = pneg %p377_p7 }
  0x66   : > { %514 = dma.done.wait (%p378_p10), %s266_s21, 512  }
  0x67   : > { %516 = vsyncadd (%p378_p10), %s266_s21, 4294966784  ;;  %s18_s14 = sadd.s32 1, %s539_s14   ;;  %s748_s9 = smov %s523_s10 }
  0x68   : > { %p15_p13 = scmp.ge.s32.totalorder %s18_s14, 4   ;;  %s749_s10 = smov %s527_s11 }
  0x69   : > { %s750_s11 = smov %s614_s22  ;;  %s751_s12 = smov %s535_s13 }
  0x6a   : > { %s752_s13 = smov %s754_s17  ;;  %17 = sbr.rel (!%p15_p13) target bundleno = 6 (0x6), region = 76 }
  0x6f   :  { %271 = vsyncpa [#allocation3], 1 }
  0x70   :  { %273 = vsyncpa [#allocation3 + $0x1], 1 }
  0x71   :  { %274 = vsyncpa [#allocation4], 1 }
  0x72   :  { %276 = vsyncpa [#allocation4 + $0x1], 1 }

</bundles_post_ra>
